<compile_context>
chip_gen: v7x
topology: tpu7x:2x2x1
jax: 0.10.0
libtpu: 0.0.40
codegen_flags: <defaults>
</compile_context>

<pallas_src>
import functools
import math

import jax
import jax.numpy as jnp
from jax.experimental import pallas as pl
from jax.experimental.pallas import tpu as pltpu


_MAX_B_TILE = 1024          # safe for 128 MiB (v5e/v6e) and 64 MiB (v7x) VMEM at these widths
_TARGET_PARALLEL_SPLITS = 2  # v7x has 2 TensorCores; aim for >= 2 grid steps when B allows


def _round_up(x: int, m: int) -> int:
    return ((x + m - 1) // m) * m


def _cdiv(a: int, b: int) -> int:
    return (a + b - 1) // b


# ---------------------------------------------------------------------------
# Kernel 1: build the effective noisy weight / bias ONCE per forward.
#   w_stack: (3, in_p, out_p) f32  = [weight_mu.T | weight_sigma.T | weight_eps.T]
#   b_stack: (3, 1,    out_p) f32  = [bias_mu     | bias_sigma     | bias_eps   ]
# Outputs: w_eff (in_p, out_p) in the MXU dtype, b_eff (1, out_p) f32.
# ---------------------------------------------------------------------------
def build_effective_kernel(w_ref, b_ref, w_eff_ref, b_eff_ref):
    w_eff_ref[...] = (w_ref[0] + w_ref[1] * w_ref[2]).astype(w_eff_ref.dtype)  # VPU, f32 math
    b_eff_ref[...] = b_ref[0] + b_ref[1] * b_ref[2]


# ---------------------------------------------------------------------------
# Kernel 2: batch-tiled MXU contraction with fused bias broadcast-add.
#   x_ref: (b_tile, in_p) f32   (cast to MXU dtype in-kernel)
#   w_ref: (in_p, out_p)  MXU dtype (already the effective noisy weight)
#   b_ref: (1, out_p)     f32
# ---------------------------------------------------------------------------
def noisy_matmul_kernel(x_ref, w_ref, b_ref, out_ref):
    x = x_ref[...].astype(w_ref.dtype)
    acc = jnp.dot(x, w_ref[...], preferred_element_type=jnp.float32)  # MXU
    out_ref[...] = acc + b_ref[...]                                   # VPU broadcast add


# ---------------------------------------------------------------------------
# Parameter / noise setup (mirrors the PyTorch module's reset_* methods).
# TODO(synk): reset_noise()/reset_parameters() are RNG-stateful buffer updates in
#             PyTorch; they are reproduced here as pure-JAX host-side helpers
#             rather than with in-kernel PRNG.
# ---------------------------------------------------------------------------
def init_noisy_linear_params(key, in_features, out_features, sigma_init=0.017):
    kw, kb = jax.random.split(key)
    mu_range = 1.0 / math.sqrt(in_features)
    return {
        "weight_mu": jax.random.uniform(
            kw, (out_features, in_features), jnp.float32, -mu_range, mu_range),
        "weight_sigma": jnp.full(
            (out_features, in_features), sigma_init / math.sqrt(in_features), jnp.float32),
        "bias_mu": jax.random.uniform(
            kb, (out_features,), jnp.float32, -mu_range, mu_range),
        "bias_sigma": jnp.full(
            (out_features,), sigma_init / math.sqrt(out_features), jnp.float32),
    }


def reset_noise(key, in_features, out_features):
    """Factorized Gaussian noise: f(z) = sign(z) * sqrt(|z|)."""
    k_in, k_out = jax.random.split(key)

    def scale(k, n):
        z = jax.random.normal(k, (n,), jnp.float32)
        return jnp.sign(z) * jnp.sqrt(jnp.abs(z))

    return {"eps_in": scale(k_in, in_features), "eps_out": scale(k_out, out_features)}


def prepare_noisy_linear(params, noise):
    """Pack mu/sigma/eps into lane-dense padded stacks (done once per noise reset)."""
    out_f, in_f = params["weight_mu"].shape
    in_p = _round_up(in_f, 128)
    out_p = _round_up(out_f, 128)

    def pack_w(w_t):  # (in_f, out_f) -> (in_p, out_p), zero padded
        return jnp.zeros((in_p, out_p), jnp.float32).at[:in_f, :out_f].set(w_t)

    def pack_b(b):    # (out_f,) -> (1, out_p), zero padded
        return jnp.zeros((1, out_p), jnp.float32).at[0, :out_f].set(b)

    w_eps = jnp.outer(noise["eps_out"], noise["eps_in"])          # (out_f, in_f)
    w_stack = jnp.stack([
        pack_w(params["weight_mu"].T),
        pack_w(params["weight_sigma"].T),
        pack_w(w_eps.T),
    ])
    b_stack = jnp.stack([
        pack_b(params["bias_mu"]),
        pack_b(params["bias_sigma"]),
        pack_b(noise["eps_out"]),
    ])
    return w_stack, b_stack, (in_f, out_f, in_p, out_p)


# ---------------------------------------------------------------------------
# Forward wrapper (jitted; all shapes / padding are static).
# ---------------------------------------------------------------------------
@functools.partial(jax.jit, static_argnums=(3, 4, 5, 6, 7))
def noisy_linear_forward(x, w_stack, b_stack, in_f, out_f, in_p, out_p, use_bf16):
    B = x.shape[0]
    mxu_dtype = jnp.bfloat16 if use_bf16 else jnp.float32
    w_itemsize = 2 if use_bf16 else 4

    # ---- Phase 1: effective noisy weight / bias (runs once, grid over out columns).
    tn = math.gcd(out_p, 512)   # multiple of 128, divides out_p exactly
    w_eff, b_eff = pl.pallas_call(
        build_effective_kernel,
        out_shape=(jax.ShapeDtypeStruct((in_p, out_p), mxu_dtype),
                   jax.ShapeDtypeStruct((1, out_p), jnp.float32)),
        grid_spec=pltpu.PrefetchScalarGridSpec(
            num_scalar_prefetch=0,
            grid=(out_p // tn,),
            in_specs=[
                pl.BlockSpec((3, in_p, tn), lambda j: (0, 0, j)),
                pl.BlockSpec((3, 1, tn), lambda j: (0, 0, j)),
            ],
            out_specs=[
                pl.BlockSpec((in_p, tn), lambda j: (0, j)),
                pl.BlockSpec((1, tn), lambda j: (0, j)),
            ]),
        compiler_params=pltpu.CompilerParams(
            dimension_semantics=("parallel",)),
    )(w_stack, b_stack)

    # ---- Phase 2: batch-tiled matmul. Aim for >= _TARGET_PARALLEL_SPLITS grid steps
    # so the "parallel" axis can shard across TensorCores (v7x megacore).
    b_tile = max(8, min(_MAX_B_TILE, _round_up(_cdiv(B, _TARGET_PARALLEL_SPLITS), 8)))
    grid_b = _cdiv(B, b_tile)
    B_pad = grid_b * b_tile

    # Only materialize a padded copy of x when actually needed (avoid the extra HBM pass).
    x_in = x.astype(jnp.float32)
    if B_pad != B or in_p != in_f:
        x_in = jnp.pad(x_in, ((0, B_pad - B), (0, in_p - in_f)))

    vmem_needed = (2 * b_tile * in_p * 4        # x tiles, double buffered
                   + in_p * out_p * w_itemsize  # w_eff, single buffered
                   + 2 * 8 * out_p * 4          # bias (tiny)
                   + 2 * b_tile * out_p * 4)    # output tiles, double buffered
    vmem_limit = min(max(int(1.5 * vmem_needed) + (4 << 20), 16 << 20), 100 << 20)

    cost = pl.CostEstimate(
        flops=2 * B_pad * in_p * out_p,
        transcendentals=0,
        bytes_accessed=(B_pad * in_p * 4 + in_p * out_p * w_itemsize
                        + out_p * 4 + B_pad * out_p * 4))

    out = pl.pallas_call(
        noisy_matmul_kernel,
        out_shape=jax.ShapeDtypeStruct((B_pad, out_p), jnp.float32),
        grid_spec=pltpu.PrefetchScalarGridSpec(
            num_scalar_prefetch=0,
            grid=(grid_b,),
            in_specs=[
                pl.BlockSpec((b_tile, in_p), lambda i: (i, 0)),
                # Effective weight never changes across batch tiles -> one buffer.
                pl.BlockSpec((in_p, out_p), lambda i: (0, 0),
                             pipeline_mode=pl.Buffered(1)),
                pl.BlockSpec((1, out_p), lambda i: (0, 0)),
            ],
            out_specs=pl.BlockSpec((b_tile, out_p), lambda i: (i, 0)),
        ),
        compiler_params=pltpu.CompilerParams(
            dimension_semantics=("parallel",),
            vmem_limit_bytes=vmem_limit),
        cost_estimate=cost,
    )(x_in, w_eff, b_eff)

    # Lane-dense slab is what a fused consumer should take; slice only at the boundary.
    return out[:B, :out_f]


# ---------------------------------------------------------------------------
# Pure-JAX reference mirroring the PyTorch NoisyLinear.forward.
# ---------------------------------------------------------------------------
def noisy_linear_ref(x, params, noise):
    w_eps = jnp.outer(noise["eps_out"], noise["eps_in"])
    weight = params["weight_mu"] + params["weight_sigma"] * w_eps
    bias = params["bias_mu"] + params["bias_sigma"] * noise["eps_out"]
    return x @ weight.T + bias


if __name__ == "__main__":
    # Small shapes consistent with a Rainbow-DQN noisy head.
    batch = 8
    in_features = 32
    out_features = 16

    key = jax.random.PRNGKey(0)
    k_param, k_noise, k_x = jax.random.split(key, 3)
    params = init_noisy_linear_params(k_param, in_features, out_features)
    noise = reset_noise(k_noise, in_features, out_features)
    x = jax.random.normal(k_x, (batch, in_features), jnp.float32)

    w_stack, b_stack, dims = prepare_noisy_linear(params, noise)   # one-time packing
    y_ref = noisy_linear_ref(x, params, noise)

    # bf16 MXU path (default / fast): relaxed tolerance.
    y_bf16 = jax.block_until_ready(
        noisy_linear_forward(x, w_stack, b_stack, *dims, True))
    assert y_bf16.shape == (batch, out_features)
    assert jnp.allclose(y_bf16, y_ref, atol=5e-2, rtol=5e-2)

    # f32 fallback path (bit-accuracy sensitive callers).
    y_f32 = jax.block_until_ready(
        noisy_linear_forward(x, w_stack, b_stack, *dims, False))
    assert y_f32.shape == (batch, out_features)
    assert jnp.allclose(y_f32, y_ref, atol=2e-2, rtol=2e-2)

    print("KERNEL_OK")
</pallas_src>

<mosaic_0001>
module attributes {stable_mosaic.version = 11 : i64} {
  func.func @build_effective_kernel(%arg0: i32, %arg1: memref<3x128x128xf32, #tpu.memory_space<vmem>>, %arg2: memref<3x1x128xf32, #tpu.memory_space<vmem>>, %arg3: memref<128x128xbf16, #tpu.memory_space<vmem>>, %arg4: memref<1x128xf32, #tpu.memory_space<vmem>>) attributes {dimension_semantics = [#tpu.dimension_semantics<parallel>], iteration_bounds = array<i64: 1>, scalar_prefetch = 0 : i64, scratch_operands = 0 : i64, tpu.core_type = #tpu.core_type<tc>, window_params = [{transform_indices = @transform_0, window_bounds = array<i64: 3, 128, 128>}, {transform_indices = @transform_1, window_bounds = array<i64: 3, 1, 128>}, {transform_indices = @transform_2, window_bounds = array<i64: 128, 128>}, {transform_indices = @transform_3, window_bounds = array<i64: 1, 128>}]} {
    %c0 = arith.constant 0 : index
    %c0_0 = arith.constant 0 : index
    %c0_1 = arith.constant 0 : index
    %0 = vector.load %arg1[%c0, %c0_0, %c0_1] : memref<3x128x128xf32, #tpu.memory_space<vmem>>, vector<1x128x128xf32>
    %1 = vector.shape_cast %0 : vector<1x128x128xf32> to vector<128x128xf32>
    %c1 = arith.constant 1 : index
    %c0_2 = arith.constant 0 : index
    %c0_3 = arith.constant 0 : index
    %2 = vector.load %arg1[%c1, %c0_2, %c0_3] : memref<3x128x128xf32, #tpu.memory_space<vmem>>, vector<1x128x128xf32>
    %3 = vector.shape_cast %2 : vector<1x128x128xf32> to vector<128x128xf32>
    %c2 = arith.constant 2 : index
    %c0_4 = arith.constant 0 : index
    %c0_5 = arith.constant 0 : index
    %4 = vector.load %arg1[%c2, %c0_4, %c0_5] : memref<3x128x128xf32, #tpu.memory_space<vmem>>, vector<1x128x128xf32>
    %5 = vector.shape_cast %4 : vector<1x128x128xf32> to vector<128x128xf32>
    %6 = arith.mulf %3, %5 : vector<128x128xf32>
    %7 = arith.addf %1, %6 : vector<128x128xf32>
    %8 = arith.truncf %7 : vector<128x128xf32> to vector<128x128xbf16>
    %c0_6 = arith.constant 0 : index
    %c0_7 = arith.constant 0 : index
    %9 = vector.load %arg3[%c0_6, %c0_7] : memref<128x128xbf16, #tpu.memory_space<vmem>>, vector<128x128xbf16>
    tpu.vector_store %arg3[%c0_6, %c0_7], %8 {strides = array<i32>} : memref<128x128xbf16, #tpu.memory_space<vmem>>, vector<128x128xbf16>,
    %c0_8 = arith.constant 0 : index
    %c0_9 = arith.constant 0 : index
    %c0_10 = arith.constant 0 : index
    %10 = vector.load %arg2[%c0_8, %c0_9, %c0_10] : memref<3x1x128xf32, #tpu.memory_space<vmem>>, vector<1x1x128xf32>
    %11 = vector.shape_cast %10 : vector<1x1x128xf32> to vector<1x128xf32>
    %c1_11 = arith.constant 1 : index
    %c0_12 = arith.constant 0 : index
    %c0_13 = arith.constant 0 : index
    %12 = vector.load %arg2[%c1_11, %c0_12, %c0_13] : memref<3x1x128xf32, #tpu.memory_space<vmem>>, vector<1x1x128xf32>
    %13 = vector.shape_cast %12 : vector<1x1x128xf32> to vector<1x128xf32>
    %c2_14 = arith.constant 2 : index
    %c0_15 = arith.constant 0 : index
    %c0_16 = arith.constant 0 : index
    %14 = vector.load %arg2[%c2_14, %c0_15, %c0_16] : memref<3x1x128xf32, #tpu.memory_space<vmem>>, vector<1x1x128xf32>
    %15 = vector.shape_cast %14 : vector<1x1x128xf32> to vector<1x128xf32>
    %16 = arith.mulf %13, %15 : vector<1x128xf32>
    %17 = arith.addf %11, %16 : vector<1x128xf32>
    %c0_17 = arith.constant 0 : index
    %c0_18 = arith.constant 0 : index
    %18 = vector.load %arg4[%c0_17, %c0_18] : memref<1x128xf32, #tpu.memory_space<vmem>>, vector<1x128xf32>
    tpu.vector_store %arg4[%c0_17, %c0_18], %17 {strides = array<i32>} : memref<1x128xf32, #tpu.memory_space<vmem>>, vector<1x128xf32>,
    return
  }
  func.func @transform_0(%arg0: i32) -> (i32, i32, i32) {
    %c0_i32 = arith.constant 0 : i32
    %c0_i32_0 = arith.constant 0 : i32
    %c0_i32_1 = arith.constant 0 : i32
    return %c0_i32, %c0_i32_0, %arg0 : i32, i32, i32
  }
  func.func @transform_1(%arg0: i32) -> (i32, i32, i32) {
    %c0_i32 = arith.constant 0 : i32
    %c0_i32_0 = arith.constant 0 : i32
    %c0_i32_1 = arith.constant 0 : i32
    return %c0_i32, %c0_i32_0, %arg0 : i32, i32, i32
  }
  func.func @transform_2(%arg0: i32) -> (i32, i32) {
    %c0_i32 = arith.constant 0 : i32
    %c0_i32_0 = arith.constant 0 : i32
    return %c0_i32, %arg0 : i32, i32
  }
  func.func @transform_3(%arg0: i32) -> (i32, i32) {
    %c0_i32 = arith.constant 0 : i32
    %c0_i32_0 = arith.constant 0 : i32
    return %c0_i32, %arg0 : i32, i32
  }
}

module attributes {stable_mosaic.version = 11 : i64} {
  func.func @noisy_matmul_kernel(%arg0: i32, %arg1: memref<8x128xf32, #tpu.memory_space<vmem>>, %arg2: memref<128x128xbf16, #tpu.memory_space<vmem>>, %arg3: memref<1x128xf32, #tpu.memory_space<vmem>>, %arg4: memref<8x128xf32, #tpu.memory_space<vmem>>) attributes {dimension_semantics = [#tpu.dimension_semantics<parallel>], iteration_bounds = array<i64: 1>, scalar_prefetch = 0 : i64, scratch_operands = 0 : i64, tpu.core_type = #tpu.core_type<tc>, window_params = [{transform_indices = @transform_0, window_bounds = array<i64: 8, 128>}, {pipeline_mode = #tpu.pipeline_mode<synchronous>, transform_indices = @transform_1, window_bounds = array<i64: 128, 128>}, {pipeline_mode = #tpu.pipeline_mode<synchronous>, transform_indices = @transform_2, window_bounds = array<i64: 1, 128>}, {transform_indices = @transform_3, window_bounds = array<i64: 8, 128>}]} {
    %c0 = arith.constant 0 : index
    %c0_0 = arith.constant 0 : index
    %0 = vector.load %arg1[%c0, %c0_0] : memref<8x128xf32, #tpu.memory_space<vmem>>, vector<8x128xf32>
    %1 = arith.truncf %0 : vector<8x128xf32> to vector<8x128xbf16>
    %c0_1 = arith.constant 0 : index
    %c0_2 = arith.constant 0 : index
    %2 = vector.load %arg2[%c0_1, %c0_2] : memref<128x128xbf16, #tpu.memory_space<vmem>>, vector<128x128xbf16>
    %cst = arith.constant dense<0.000000e+00> : vector<8x128xf32>
    %3 = tpu.matmul %1, %2, %cst {dimension_numbers = #tpu.dot_dimension_numbers<[1], [0], [0], [1], [0, 0, 1, 1], [], []>} : vector<8x128xbf16>, vector<128x128xbf16>, vector<8x128xf32> -> vector<8x128xf32>
    %c0_3 = arith.constant 0 : index
    %c0_4 = arith.constant 0 : index
    %4 = vector.load %arg3[%c0_3, %c0_4] : memref<1x128xf32, #tpu.memory_space<vmem>>, vector<1x128xf32>
    %5 = vector.broadcast %4 : vector<1x128xf32> to vector<8x128xf32>
    %6 = arith.addf %3, %5 : vector<8x128xf32>
    %c0_5 = arith.constant 0 : index
    %c0_6 = arith.constant 0 : index
    %7 = vector.load %arg4[%c0_5, %c0_6] : memref<8x128xf32, #tpu.memory_space<vmem>>, vector<8x128xf32>
    tpu.vector_store %arg4[%c0_5, %c0_6], %6 {strides = array<i32>} : memref<8x128xf32, #tpu.memory_space<vmem>>, vector<8x128xf32>,
    return
  }
  func.func @transform_0(%arg0: i32) -> (i32, i32) {
    %c0_i32 = arith.constant 0 : i32
    %c0_i32_0 = arith.constant 0 : i32
    return %arg0, %c0_i32 : i32, i32
  }
  func.func @transform_1(%arg0: i32) -> (i32, i32) {
    %c0_i32 = arith.constant 0 : i32
    %c0_i32_0 = arith.constant 0 : i32
    %c0_i32_1 = arith.constant 0 : i32
    return %c0_i32, %c0_i32_0 : i32, i32
  }
  func.func @transform_2(%arg0: i32) -> (i32, i32) {
    %c0_i32 = arith.constant 0 : i32
    %c0_i32_0 = arith.constant 0 : i32
    %c0_i32_1 = arith.constant 0 : i32
    return %c0_i32, %c0_i32_0 : i32, i32
  }
  func.func @transform_3(%arg0: i32) -> (i32, i32) {
    %c0_i32 = arith.constant 0 : i32
    %c0_i32_0 = arith.constant 0 : i32
    return %arg0, %c0_i32 : i32, i32
  }
}

</mosaic_0001>

<bundles_post_ra>
// kernel: noisy_linear_forward.3
= control target key start
LH: loop header
LB: loop body
LE: loop exit
PB: predicated region body
PF: predicated region fallthrough
CT: control target
= control target key end

     0   :  { %v217_v1 = vmov 0.0   ;;  %vm218_vm0 = vmmov 0   ;;  %s282_s0 = inlined_call_operand.vmem [shape: f32[8,128], index: 0, kind: input, shape index: {}]   ;;  %s283_s1 = inlined_call_operand.vmem [shape: bf16[128,128], index: 1, kind: input, shape index: {}]   ;;  %s284_s2 = inlined_call_operand.vmem [shape: f32[1,128], index: 2, kind: input, shape index: {}]   ;;  %s285_s3 = inlined_call_operand.hbm [shape: f32[8,128], index: 3, kind: output, shape index: {}]  }
   0x1   :  { %v185_v0 = vld [vmem:[%s283_s1] sm:$0xff]   ;;  %162 = vmatprep.subr.bf16.mxu0 %v217_v1  ;;  %v186_v2 = vld [vmem:[%s283_s1 + $0x8] sm:$0xff]   ;;  %178 = vmatprep.mubr.msk.bf16.mxu0 %vm218_vm0, %v217_v1  ;;  %v187_v3 = vld [vmem:[%s283_s1 + $0x10] sm:$0xff]  }
   0x2   :  { %163 = vmatpush3.bf16.msra.mxu0 %v185_v0 }
   0x3   :  { %164 = vmatprep.subr.bf16.mxu0 %v217_v1 }
   0x6   :  { %165 = vmatpush3.bf16.msra.mxu0 %v186_v2 }
   0x7   :  { %166 = vmatprep.subr.bf16.mxu0 %v217_v1 }
   0x8   :  { %8 = vsyncpa [#allocation3], 0  ;;  %v188_v4 = vld [vmem:[%s283_s1 + $0x18] sm:$0xff]   ;;  %v189_v5 = vld [vmem:[%s283_s1 + $0x20] sm:$0xff]   ;;  %s219_s5 = smov [#allocation2]  }
   0x9   :  { %v190_v6 = vld [vmem:[%s283_s1 + $0x28] sm:$0xff]   ;;  %v191_v7 = vld [vmem:[%s283_s1 + $0x30] sm:$0xff]   ;;  %v192_v8 = vld [vmem:[%s283_s1 + $0x38] sm:$0xff]   ;;  %s136_s6 = sshll.u32 %s219_s5, 4  ;;  %s137_s6 = int_to_ptr.vmem [resolvable:$true] %s136_s6 }
   0xa   :  { %167 = vmatpush3.bf16.msra.mxu0 %v187_v3  ;;  %v16_v9 = vld [vmem:[%s282_s0] sm:$0xff]  ;;  %s193_s1 = scalar_lea.vmem %s137_s6, 128  ;;  %p198_p1 = scmp.lt.s32.totalorder %s137_s6, %s137_s6 }
   0xb   :  { %168 = vmatprep.subr.bf16.mxu0 %v217_v1  ;;  %v17_v10 = vpack.c.bf16 %v16_v9, %v16_v9  ;;  %v144_v11 = vld [vmem:[%s284_s2] ss:$0 sm:$0xff]  ;;  %p194_p0 = scmp.ne.s32.totalorder %s137_s6, %s193_s1  ;;  %p199_p2 = scmp.lt.s32.totalorder %s193_s1, %s193_s1 }
   0xd   :  { %p200_p3 = por %p199_p2, %p198_p1 }
   0xe   :  { %169 = vmatpush3.bf16.msra.mxu0 %v188_v4 }
   0xf   :  { %170 = vmatprep.subr.bf16.mxu0 %v217_v1  ;;  %p201_p4 = pnand %p200_p3, %p194_p0 }
  0x12   :  { %171 = vmatpush3.bf16.msra.mxu0 %v189_v5 }
  0x13   :  { %172 = vmatprep.subr.bf16.mxu0 %v217_v1 }
  0x16   :  { %173 = vmatpush3.bf16.msra.mxu0 %v190_v6 }
  0x17   :  { %174 = vmatprep.subr.bf16.mxu0 %v217_v1 }
  0x1a   :  { %175 = vmatpush3.bf16.msra.mxu0 %v191_v7 }
  0x1b   :  { %176 = vmatprep.subr.bf16.mxu0 %v217_v1 }
  0x1e   :  { %177 = vmatpush3.bf16.msra.mxu0 %v192_v8 }
  0x21   :  { %179 = vmatmul.mubr.bf16.vlgmr.msra.gmra.mrb[0].mxu0 %v17_v10 }
  0xf4   :  { %v123_v12 = vpop.f32.mrb[0].mxu0 }
  0xf5   :  { %v124_v13 = vadd.f32 %v144_v11, %v123_v12  ;;  %v180_v14 = vpop.f32.mrb[1].mxu0 }
  0xf6   :  { %v126_v15 = vpop.f32.mrb[2].mxu0 }
  0xf7   :  { %129 = vst [vmem:[#allocation2] sm:$0xff] %v124_v13  ;;  %v181_v16 = vpop.f32.mrb[3].mxu0 }
  0xf8   :  { %204 = shalt.err (!%p201_p4)
}
  0xf9   :  { %s205_s2 = scalar_lea.hbm %s285_s3, 128 }
  0xfa   :  { %p206_p5 = scmp.ne.s32.totalorder %s285_s3, %s205_s2  ;;  %p209_p6 = scmp.lt.u32.totalorder %s205_s2, %s285_s3 }
  0xfc   :  { %p211_p7 = pnand %p209_p6, %p206_p5 }
  0xfe   :  { %214 = shalt.err (!%p211_p7)
}
  0xff   :  { %139 = dma.vmem_to_hbm [thread:$0]  %s137_s6, 128, %s285_s3, [#allocation3]  }
 0x100   :  { %215 = dma.done.wait [#allocation3], 128  }
 0x101   :  { %216 = vsyncadd [#allocation3], 4294967168 }
 0x102   :  { %143 = vsyncpa [#allocation3], 1 }

// kernel: noisy_linear_forward.2
= control target key start
LH: loop header
LB: loop body
LE: loop exit
PB: predicated region body
PF: predicated region fallthrough
CT: control target
= control target key end

     0   :  { %9 = vsyncpa [#allocation3], 0  ;;  %s314_s12 = smov [#allocation2]   ;;  %s385_s0 = inlined_call_operand.hbm [shape: f32[3,128,128], index: 0, kind: input, shape index: {}]   ;;  %s386_s1 = inlined_call_operand.vmem [shape: f32[3,1,128], index: 1, kind: input, shape index: {}]   ;;  %s387_s2 = inlined_call_operand.vmem [shape: bf16[128,128], index: 2, kind: output, shape index: {0}]   ;;  %s388_s3 = inlined_call_operand.vmem [shape: f32[1,128], index: 3, kind: output, shape index: {1}]  }
   0x1   :  { %s15_s13 = sshll.u32 %s314_s12, 4  ;;  %s290_s16 = scalar_lea.hbm %s385_s0, 6144  ;;  %s16_s13 = int_to_ptr.vmem [resolvable:$true] %s15_s13 }
   0x2   :  { %p291_p0 = scmp.ne.s32.totalorder %s385_s0, %s290_s16  ;;  %p294_p1 = scmp.lt.u32.totalorder %s290_s16, %s385_s0 }
   0x4   :  { %p296_p2 = pnand %p294_p1, %p291_p0 }
   0x6   :  { %299 = shalt.err (!%p296_p2)
}
   0x7   :  { %s300_s21 = scalar_lea.vmem %s16_s13, 6144  ;;  %p305_p4 = scmp.lt.s32.totalorder %s16_s13, %s16_s13 }
   0x8   :  { %p301_p3 = scmp.ne.s32.totalorder %s16_s13, %s300_s21  ;;  %p306_p5 = scmp.lt.s32.totalorder %s300_s21, %s300_s21 }
   0xa   :  { %p307_p6 = por %p306_p5, %p305_p4 }
   0xc   :  { %p308_p7 = pnand %p307_p6, %p301_p3 }
   0xe   :  { %311 = shalt.err (!%p308_p7)
}
   0xf   :  { %s315_s22 = smov 128   ;;  %s316_s23 = smov 8  }
  0x10   :  { %21 = dma.hbm_to_vmem [thread:$0]  %s385_s0, 6144, %s16_s13, [#allocation3], %s315_s22, %s315_s22, %s316_s23  }
  0x11   :  { %312 = dma.done.wait [#allocation3], 6144  }
  0x12   :  { %313 = vsyncadd [#allocation3], 4294961152  ;;  %v27_v0 = vld [vmem:[#allocation2] sm:$0xff]  ;;  %v28_v1 = vld [vmem:[#allocation2 + $0x8] sm:$0xff] }
  0x13   :  { %v44_v2 = vld [vmem:[#allocation2 + $0x80] sm:$0xff]  ;;  %v45_v3 = vld [vmem:[#allocation2 + $0x88] sm:$0xff]  ;;  %v29_v8 = vld [vmem:[#allocation2 + $0x10] sm:$0xff] }
  0x14   :  { %v61_v4 = vld [vmem:[#allocation2 + $0x100] sm:$0xff]  ;;  %v62_v5 = vld [vmem:[#allocation2 + $0x108] sm:$0xff]  ;;  %v30_v9 = vld [vmem:[#allocation2 + $0x18] sm:$0xff] }
  0x15   :  { %v77_v6 = vmul.f32 %v61_v4, %v44_v2  ;;  %v78_v7 = vmul.f32 %v62_v5, %v45_v3  ;;  %v46_v10 = vld [vmem:[#allocation2 + $0x90] sm:$0xff]  ;;  %v47_v11 = vld [vmem:[#allocation2 + $0x98] sm:$0xff]  ;;  %v31_v18 = vld [vmem:[#allocation2 + $0x20] sm:$0xff] }
  0x16   :  { %v63_v12 = vld [vmem:[#allocation2 + $0x110] sm:$0xff]  ;;  %v64_v13 = vld [vmem:[#allocation2 + $0x118] sm:$0xff]  ;;  %v32_v19 = vld [vmem:[#allocation2 + $0x28] sm:$0xff] }
  0x17   :  { %v93_v14 = vadd.f32 %v77_v6, %v27_v0  ;;  %v94_v15 = vadd.f32 %v78_v7, %v28_v1  ;;  %v79_v16 = vmul.f32 %v63_v12, %v46_v10  ;;  %v80_v17 = vmul.f32 %v64_v13, %v47_v11  ;;  %v48_v20 = vld [vmem:[#allocation2 + $0xa0] sm:$0xff]  ;;  %v49_v21 = vld [vmem:[#allocation2 + $0xa8] sm:$0xff]  ;;  %v33_v28 = vld [vmem:[#allocation2 + $0x30] sm:$0xff] }
  0x18   :  { %v65_v22 = vld [vmem:[#allocation2 + $0x120] sm:$0xff]  ;;  %v66_v23 = vld [vmem:[#allocation2 + $0x128] sm:$0xff]  ;;  %v34_v29 = vld [vmem:[#allocation2 + $0x38] sm:$0xff] }
  0x19   :  { %v243_v24 = vpack.c.bf16 %v94_v15, %v93_v14  ;;  %v95_v25 = vadd.f32 %v79_v16, %v29_v8  ;;  %v96_v26 = vadd.f32 %v80_v17, %v30_v9  ;;  %v81_v27 = vmul.f32 %v65_v22, %v48_v20  ;;  %v50_v30 = vld [vmem:[#allocation2 + $0xb0] sm:$0xff]  ;;  %v51_v32 = vld [vmem:[#allocation2 + $0xb8] sm:$0xff]  ;;  %v35_v39 = vld [vmem:[#allocation2 + $0x40] sm:$0xff] }
  0x1a   :  { %v82_v31 = vmul.f32 %v66_v23, %v49_v21  ;;  %v67_v33 = vld [vmem:[#allocation2 + $0x130] sm:$0xff]  ;;  %v68_v34 = vld [vmem:[#allocation2 + $0x138] sm:$0xff]  ;;  %v36_v40 = vld [vmem:[#allocation2 + $0x48] sm:$0xff] }
  0x1b   :  { %244 = vst [vmem:[%s387_s2] sm:$0xff] %v243_v24   ;;  %v248_v35 = vpack.c.bf16 %v96_v26, %v95_v25  ;;  %v97_v36 = vadd.f32 %v81_v27, %v31_v18  ;;  %v83_v37 = vmul.f32 %v67_v33, %v50_v30  ;;  %v84_v38 = vmul.f32 %v68_v34, %v51_v32  ;;  %v52_v41 = vld [vmem:[#allocation2 + $0xc0] sm:$0xff]  ;;  %v53_v43 = vld [vmem:[#allocation2 + $0xc8] sm:$0xff]  ;;  %v37_v50 = vld [vmem:[#allocation2 + $0x50] sm:$0xff] }
  0x1c   :  { %v98_v42 = vadd.f32 %v82_v31, %v32_v19  ;;  %v69_v44 = vld [vmem:[#allocation2 + $0x140] sm:$0xff]  ;;  %v70_v45 = vld [vmem:[#allocation2 + $0x148] sm:$0xff]  ;;  %v38_v51 = vld [vmem:[#allocation2 + $0x58] sm:$0xff] }
  0x1d   :  { %280 = vst [vmem:[%s387_s2 + $0x8] sm:$0xff] %v248_v35   ;;  %v99_v46 = vadd.f32 %v83_v37, %v33_v28  ;;  %v100_v47 = vadd.f32 %v84_v38, %v34_v29  ;;  %v85_v48 = vmul.f32 %v69_v44, %v52_v41  ;;  %v86_v49 = vmul.f32 %v70_v45, %v53_v43  ;;  %v54_v52 = vld [vmem:[#allocation2 + $0xd0] sm:$0xff]  ;;  %v55_v54 = vld [vmem:[#allocation2 + $0xd8] sm:$0xff]  ;;  %v39_v61 = vld [vmem:[#allocation2 + $0x60] sm:$0xff] }
  0x1e   :  { %v253_v53 = vpack.c.bf16 %v98_v42, %v97_v36  ;;  %v71_v55 = vld [vmem:[#allocation2 + $0x150] sm:$0xff]  ;;  %v72_v56 = vld [vmem:[#allocation2 + $0x158] sm:$0xff]  ;;  %v40_v62 = vld [vmem:[#allocation2 + $0x68] sm:$0xff] }
  0x1f   :  { %v258_v57 = vpack.c.bf16 %v100_v47, %v99_v46  ;;  %v101_v58 = vadd.f32 %v85_v48, %v35_v39  ;;  %v102_v59 = vadd.f32 %v86_v49, %v36_v40  ;;  %v87_v60 = vmul.f32 %v71_v55, %v54_v52  ;;  %v56_v63 = vld [vmem:[#allocation2 + $0xe0] sm:$0xff]  ;;  %v57_v1 = vld [vmem:[#allocation2 + $0xe8] sm:$0xff]  ;;  %v41_v8 = vld [vmem:[#allocation2 + $0x70] sm:$0xff] }
  0x20   :  { %281 = vst [vmem:[%s387_s2 + $0x10] sm:$0xff] %v253_v53   ;;  %v88_v0 = vmul.f32 %v72_v56, %v55_v54  ;;  %v73_v2 = vld [vmem:[#allocation2 + $0x160] sm:$0xff]  ;;  %v74_v3 = vld [vmem:[#allocation2 + $0x168] sm:$0xff]  ;;  %v42_v9 = vld [vmem:[#allocation2 + $0x78] sm:$0xff] }
  0x21   :  { %282 = vst [vmem:[%s387_s2 + $0x18] sm:$0xff] %v258_v57   ;;  %v263_v4 = vpack.c.bf16 %v102_v59, %v101_v58  ;;  %v103_v5 = vadd.f32 %v87_v60, %v37_v50  ;;  %v89_v6 = vmul.f32 %v73_v2, %v56_v63  ;;  %v90_v7 = vmul.f32 %v74_v3, %v57_v1  ;;  %v58_v10 = vld [vmem:[#allocation2 + $0xf0] sm:$0xff]  ;;  %v59_v12 = vld [vmem:[#allocation2 + $0xf8] sm:$0xff] }
  0x22   :  { %v104_v11 = vadd.f32 %v88_v0, %v38_v51  ;;  %v75_v13 = vld [vmem:[#allocation2 + $0x170] sm:$0xff]  ;;  %v76_v14 = vld [vmem:[#allocation2 + $0x178] sm:$0xff] }
  0x23   :  { %283 = vst [vmem:[%s387_s2 + $0x20] sm:$0xff] %v263_v4   ;;  %v105_v15 = vadd.f32 %v89_v6, %v39_v61  ;;  %v106_v16 = vadd.f32 %v90_v7, %v40_v62  ;;  %v91_v17 = vmul.f32 %v75_v13, %v58_v10  ;;  %v92_v18 = vmul.f32 %v76_v14, %v59_v12  ;;  %v189_v19 = vld [vmem:[%s386_s1] sm:$0x1]  ;;  %v222_v20 = vld [vmem:[%s386_s1 + $0x1] sm:$0x1] }
  0x24   :  { %v223_v21 = vld [vmem:[%s386_s1 + $0x2] sm:$0x1]  ;;  %v268_v22 = vpack.c.bf16 %v104_v11, %v103_v5 }
  0x25   :  { %v194_v23 = vmul.f32 %v223_v21, %v222_v20  ;;  %v273_v24 = vpack.c.bf16 %v106_v16, %v105_v15  ;;  %v107_v25 = vadd.f32 %v91_v17, %v41_v8  ;;  %v108_v26 = vadd.f32 %v92_v18, %v42_v9 }
  0x26   :  { %284 = vst [vmem:[%s387_s2 + $0x28] sm:$0xff] %v268_v22  }
  0x27   :  { %v195_v27 = vadd.f32 %v194_v23, %v189_v19  ;;  %285 = vst [vmem:[%s387_s2 + $0x30] sm:$0xff] %v273_v24   ;;  %v278_v28 = vpack.c.bf16 %v108_v26, %v107_v25 }
  0x29   :  { %196 = vst [vmem:[%s388_s3] sm:$0x1] %v195_v27  ;;  %286 = vst [vmem:[%s387_s2 + $0x38] sm:$0xff] %v278_v28  }
  0x2a   :  { %205 = vsyncpa [#allocation3], 1 }

</bundles_post_ra>
